<compile_context>
chip_gen: v7x
topology: tpu7x:2x2x1
jax: 0.10.0
libtpu: 0.0.40
codegen_flags: <defaults>
</compile_context>

<pallas_src>
import functools

import jax
import jax.numpy as jnp
from jax.experimental import pallas as pl
from jax.experimental.pallas import tpu as pltpu


def _round_up(x, m):
    return (x + m - 1) // m * m


# ----------------------------------------------------------------------------
# Kernel-side compute
# ----------------------------------------------------------------------------
def _lstm_cell(xh, c_prev, w_fused, b_fused, H):
    """One fused LSTM cell step.

    xh:(1,K) concatenated [input, h_prev]; w_fused:(K, >=4H); b_fused:(1, >=4H).
    """
    gates = jnp.dot(xh, w_fused, preferred_element_type=jnp.float32) + b_fused
    # Whole-vreg nonlinearities (2 EUP sweeps), then slice gate quarters.
    sig = jax.nn.sigmoid(gates)
    th = jnp.tanh(gates)
    i = sig[:, 0 * H:1 * H]
    f = sig[:, 1 * H:2 * H]
    g = th[:, 2 * H:3 * H]
    o = sig[:, 3 * H:4 * H]
    c_new = f * c_prev + i * g
    h_new = o * jnp.tanh(c_new)
    return h_new, c_new


def _load_weights(w_ref, b_ref, I, H):
    """Slice the packed weight / bias slabs (static, sublane-aligned offsets)."""
    K0 = I + H          # layer-0 fused contraction dim
    K1 = 2 * H          # layer-1 fused contraction dim
    w0 = w_ref[0:K0, :]
    w1 = w_ref[K0:K0 + K1, :]
    wout = w_ref[K0 + K1:K0 + K1 + H, :]
    b0 = b_ref[0:1, :]
    b1 = b_ref[1:2, :]
    bout = b_ref[2:3, :]
    return w0, w1, wout, b0, b1, bout


def _step_compute(carry, wts, I, H, O, CW):
    """One controller step on the packed carry.

    carry layout (lanes): [x(I) | h_l0(H) | h_l1(H) | c_l0(H) | c_l1(H) | pad].
    Returns (padded logits (1, BW), new carry (1, CW)) — new carry has the same
    layout with logits in the x slot (self-feeding, since O == I).
    """
    w0, w1, wout, b0, b1, bout = wts
    K0 = I + H

    xh0 = carry[:, 0:K0]                         # [x, h_l0] — contiguous
    h1_old = carry[:, K0:K0 + H]                 # previous layer-1 hidden
    c0_old = carry[:, K0 + H:K0 + 2 * H]         # previous layer-0 cell
    c1_old = carry[:, K0 + 2 * H:K0 + 3 * H]     # previous layer-1 cell

    # LSTM layer 0 (single fused matmul)
    h1, c1 = _lstm_cell(xh0, c0_old, w0, b0, H)
    # LSTM layer 1 (single fused matmul)
    xh1 = jnp.concatenate([h1, h1_old], axis=-1)
    h2, c2 = _lstm_cell(xh1, c1_old, w1, b1, H)

    # hidden_to_hyper head (output lanes padded to 128 => unmasked store)
    logits_full = jnp.dot(h2, wout, preferred_element_type=jnp.float32) + bout

    pieces = [logits_full[:, 0:O], h1, h2, c1, c2]
    used = O + 4 * H
    if CW > used:
        pieces.append(jnp.zeros((1, CW - used), jnp.float32))
    new_carry = jnp.concatenate(pieces, axis=-1)  # (1, CW), lane-dense
    return logits_full, new_carry


def _make_step_kernel(I, H, O, CW):
    def kernel(carry_ref, w_ref, b_ref, out_ref):
        wts = _load_weights(w_ref, b_ref, I, H)
        _, new_carry = _step_compute(carry_ref[...], wts, I, H, O, CW)
        out_ref[...] = new_carry
    return kernel


def _make_seq_kernel(I, H, O, CW, T):
    def kernel(carry_ref, w_ref, b_ref, logits_ref, carry_out_ref):
        wts = _load_weights(w_ref, b_ref, I, H)

        def body(t, carry):
            logits_full, new_carry = _step_compute(carry, wts, I, H, O, CW)
            logits_ref[pl.ds(t, 1), :] = logits_full
            return new_carry

        final = jax.lax.fori_loop(0, T, body, carry_ref[...], unroll=True)
        carry_out_ref[...] = final
    return kernel


# ----------------------------------------------------------------------------
# pallas_call builders (cached -> compile once per shape)
# ----------------------------------------------------------------------------
_VMEM = pl.BlockSpec(memory_space=pltpu.MemorySpace.VMEM)


@functools.lru_cache(maxsize=None)
def _build_step_call(I, H, O, CW, BW):
    call = pl.pallas_call(
        _make_step_kernel(I, H, O, CW),
        out_shape=jax.ShapeDtypeStruct((1, CW), jnp.float32),
        in_specs=[_VMEM, _VMEM, _VMEM],
        out_specs=_VMEM,
    )
    return jax.jit(call)


@functools.lru_cache(maxsize=None)
def _build_seq_call(I, H, O, CW, BW, T):
    call = pl.pallas_call(
        _make_seq_kernel(I, H, O, CW, T),
        out_shape=(
            jax.ShapeDtypeStruct((T, BW), jnp.float32),   # per-step padded logits
            jax.ShapeDtypeStruct((1, CW), jnp.float32),   # final carry
        ),
        in_specs=[_VMEM, _VMEM, _VMEM],
        out_specs=(_VMEM, _VMEM),
    )
    return jax.jit(call)


# ----------------------------------------------------------------------------
# Host-side packing (one-time) and wrappers
# ----------------------------------------------------------------------------
def pack_params(params, input_size):
    """One-time packing: fuse ih/hh weights + biases, transpose, pad, stack."""
    H = params["whh0"].shape[1]
    I = int(input_size)
    O = params["wout"].shape[0]
    assert I % 8 == 0 and H % 8 == 0, "pad input/hidden sizes to multiples of 8"
    assert I == O, "controller feeds logits back as x (input_size == output_size)"

    BW = max(_round_up(4 * H, 128), _round_up(O, 128), 128)   # slab lane width
    CW = _round_up(I + 4 * H, 128)                            # carry lane width

    def pad_cols(a, width):
        return jnp.pad(a, ((0, 0), (0, width - a.shape[1])))

    # Fused per-layer weights: gates = [x, h] @ [W_ih^T ; W_hh^T]
    w0 = jnp.concatenate([params["wih0"].T, params["whh0"].T], axis=0)   # (I+H, 4H)
    w1 = jnp.concatenate([params["wih1"].T, params["whh1"].T], axis=0)   # (2H, 4H)
    wout = params["wout"].T                                              # (H, O)
    W = jnp.concatenate(
        [pad_cols(w0, BW), pad_cols(w1, BW), pad_cols(wout, BW)], axis=0)

    b0 = (params["bih0"] + params["bhh0"]).reshape(1, -1)
    b1 = (params["bih1"] + params["bhh1"]).reshape(1, -1)
    bo = params["bout"].reshape(1, -1)
    B = jnp.concatenate(
        [pad_cols(b0, BW), pad_cols(b1, BW), pad_cols(bo, BW)], axis=0)  # (3, BW)

    return {"W": W, "B": B, "I": I, "H": H, "O": O, "BW": BW, "CW": CW}


def pack_carry(x, h, c, packed):
    """Pack (x, h, c) into the lane-dense carry slab (done once at t=0)."""
    H, CW = packed["H"], packed["CW"]
    row = jnp.concatenate(
        [x.reshape(1, -1),
         h[0].reshape(1, H), h[1].reshape(1, H),
         c[0].reshape(1, H), c[1].reshape(1, H)], axis=-1)
    return jnp.pad(row, ((0, 0), (0, CW - row.shape[-1])))


def rnn_step_carry(carry, packed):
    """Fast path: carry -> carry, zero wrapper ops per step."""
    fn = _build_step_call(packed["I"], packed["H"], packed["O"],
                          packed["CW"], packed["BW"])
    return fn(carry, packed["W"], packed["B"])


def rnn_forward(x, h, packed):
    """Torch-API compatible: mirrors RNN.forward(x, h) -> (logits, (h, c))."""
    h0, c0 = h
    carry = pack_carry(x, h0, c0, packed)
    new = rnn_step_carry(carry, packed)
    O, H = packed["O"], packed["H"]
    logits = new[:, 0:O]
    h_new = jnp.stack([new[:, O:O + H], new[:, O + H:O + 2 * H]], axis=0)
    c_new = jnp.stack([new[:, O + 2 * H:O + 3 * H], new[:, O + 3 * H:O + 4 * H]],
                      axis=0)
    return logits, (h_new, c_new)


def rnn_generate(carry0, packed, nb_steps):
    """Run nb_steps of the controller recurrence (x_{t+1} = logits_t) in ONE
    pallas_call. Returns (logits (T, O), final carry)."""
    fn = _build_seq_call(packed["I"], packed["H"], packed["O"],
                         packed["CW"], packed["BW"], int(nb_steps))
    logits_full, carry_T = fn(carry0, packed["W"], packed["B"])
    return logits_full[:, 0:packed["O"]], carry_T


# ----------------------------------------------------------------------------
# Pure-JAX reference (for correctness check of fused layout / gate offsets)
# ----------------------------------------------------------------------------
def _ref_lstm_cell(x, h, c, wih, whh, bih, bhh):
    hi = jax.lax.Precision.HIGHEST
    gates = (jnp.dot(x, wih.T, precision=hi) + jnp.dot(h, whh.T, precision=hi)
             + bih + bhh)
    i, f, g, o = jnp.split(gates, 4, axis=-1)
    c_new = jax.nn.sigmoid(f) * c + jax.nn.sigmoid(i) * jnp.tanh(g)
    h_new = jax.nn.sigmoid(o) * jnp.tanh(c_new)
    return h_new, c_new


def ref_forward(x, h, c, params):
    h1, c1 = _ref_lstm_cell(x, h[0], c[0], params["wih0"], params["whh0"],
                            params["bih0"], params["bhh0"])
    h2, c2 = _ref_lstm_cell(h1, h[1], c[1], params["wih1"], params["whh1"],
                            params["bih1"], params["bhh1"])
    y = jnp.dot(h2, params["wout"].T, precision=jax.lax.Precision.HIGHEST) \
        + params["bout"]
    return y, jnp.stack([h1, h2]), jnp.stack([c1, c2])


# ----------------------------------------------------------------------------
# Parameter init (mimics torch's U(-1/sqrt(H), 1/sqrt(H)))
# ----------------------------------------------------------------------------
def init_params(key, input_size, hidden_size, output_size):
    H, I, O = hidden_size, input_size, output_size
    bound = 1.0 / jnp.sqrt(jnp.float32(H))
    ks = jax.random.split(key, 10)

    def u(k, shape):
        return jax.random.uniform(k, shape, jnp.float32, -bound, bound)

    return {
        "wih0": u(ks[0], (4 * H, I)), "whh0": u(ks[1], (4 * H, H)),
        "bih0": u(ks[2], (4 * H,)),   "bhh0": u(ks[3], (4 * H,)),
        "wih1": u(ks[4], (4 * H, H)), "whh1": u(ks[5], (4 * H, H)),
        "bih1": u(ks[6], (4 * H,)),   "bhh1": u(ks[7], (4 * H,)),
        "wout": u(ks[8], (O, H)),     "bout": u(ks[9], (O,)),
    }


if __name__ == "__main__":
    # s_space of length 8 -> input_size = output_size = 8; hidden_size = 32.
    INPUT_SIZE = 8
    HIDDEN_SIZE = 32
    OUTPUT_SIZE = 8
    NB_STEPS = 4   # generate_arch default nb_layer

    key = jax.random.PRNGKey(0)
    k_params, k_h, k_c = jax.random.split(key, 3)

    params = init_params(k_params, INPUT_SIZE, HIDDEN_SIZE, OUTPUT_SIZE)
    packed = pack_params(params, INPUT_SIZE)   # one-time: fuse/transpose/pad

    # self.x = zeros(input_size).unsqueeze(0); init_hidden(): U(-0.8, 0.8)
    x = jnp.zeros((1, INPUT_SIZE), dtype=jnp.float32)
    h0 = jax.random.uniform(k_h, (2, 1, HIDDEN_SIZE), jnp.float32, -0.8, 0.8)
    c0 = jax.random.uniform(k_c, (2, 1, HIDDEN_SIZE), jnp.float32, -0.8, 0.8)

    # --- single forward step (torch-API compatible) --------------------------
    logits, (h_new, c_new) = rnn_forward(x, (h0, c0), packed)
    jax.block_until_ready((logits, h_new, c_new))
    assert logits.shape == (1, OUTPUT_SIZE)
    assert h_new.shape == (2, 1, HIDDEN_SIZE)
    assert c_new.shape == (2, 1, HIDDEN_SIZE)

    y_ref, h_ref, c_ref = ref_forward(x, h0, c0, params)
    assert bool(jnp.allclose(logits, y_ref, atol=2e-3, rtol=2e-3))
    assert bool(jnp.allclose(h_new, h_ref, atol=2e-3, rtol=2e-3))
    assert bool(jnp.allclose(c_new, c_ref, atol=2e-3, rtol=2e-3))

    # --- multi-step recurrence fused into one kernel (generate_arch path) ----
    carry0 = pack_carry(x, h0, c0, packed)
    logits_seq, carry_T = rnn_generate(carry0, packed, NB_STEPS)
    jax.block_until_ready((logits_seq, carry_T))
    assert logits_seq.shape == (NB_STEPS, OUTPUT_SIZE)

    xr, hr, cr = x, h0, c0
    for t in range(NB_STEPS):
        yr, hr, cr = ref_forward(xr, hr, cr, params)
        assert bool(jnp.allclose(logits_seq[t:t + 1], yr, atol=3e-3, rtol=3e-3))
        xr = yr   # controller feeds its logits back as next input

    assert bool(jnp.all(jnp.isfinite(logits_seq)))
    print("KERNEL_OK")
</pallas_src>

<mosaic_0001>
module attributes {stable_mosaic.version = 11 : i64} {
  func.func @kernel(%arg0: memref<1x256xf32, #tpu.memory_space<vmem>>, %arg1: memref<136x128xf32, #tpu.memory_space<vmem>>, %arg2: memref<3x128xf32, #tpu.memory_space<vmem>>, %arg3: memref<1x256xf32, #tpu.memory_space<vmem>>) attributes {dimension_semantics = [], scalar_prefetch = 0 : i64, scratch_operands = 0 : i64, tpu.core_type = #tpu.core_type<tc>} {
    %c0 = arith.constant 0 : index
    %c0_0 = arith.constant 0 : index
    %0 = vector.load %arg1[%c0, %c0_0] : memref<136x128xf32, #tpu.memory_space<vmem>>, vector<40x128xf32>
    %c40 = arith.constant 40 : index
    %c0_1 = arith.constant 0 : index
    %1 = vector.load %arg1[%c40, %c0_1] : memref<136x128xf32, #tpu.memory_space<vmem>>, vector<64x128xf32>
    %c104 = arith.constant 104 : index
    %c0_2 = arith.constant 0 : index
    %2 = vector.load %arg1[%c104, %c0_2] : memref<136x128xf32, #tpu.memory_space<vmem>>, vector<32x128xf32>
    %c0_3 = arith.constant 0 : index
    %c0_4 = arith.constant 0 : index
    %3 = vector.load %arg2[%c0_3, %c0_4] : memref<3x128xf32, #tpu.memory_space<vmem>>, vector<1x128xf32>
    %c1 = arith.constant 1 : index
    %c0_5 = arith.constant 0 : index
    %4 = vector.load %arg2[%c1, %c0_5] : memref<3x128xf32, #tpu.memory_space<vmem>>, vector<1x128xf32>
    %c2 = arith.constant 2 : index
    %c0_6 = arith.constant 0 : index
    %5 = vector.load %arg2[%c2, %c0_6] : memref<3x128xf32, #tpu.memory_space<vmem>>, vector<1x128xf32>
    %c0_7 = arith.constant 0 : index
    %c0_8 = arith.constant 0 : index
    %6 = vector.load %arg0[%c0_7, %c0_8] : memref<1x256xf32, #tpu.memory_space<vmem>>, vector<1x256xf32>
    %7 = vector.extract_strided_slice %6 {offsets = [0, 0], sizes = [1, 40], strides = [1, 1]} : vector<1x256xf32> to vector<1x40xf32>
    %8 = vector.extract_strided_slice %6 {offsets = [0, 40], sizes = [1, 32], strides = [1, 1]} : vector<1x256xf32> to vector<1x32xf32>
    %9 = vector.extract_strided_slice %6 {offsets = [0, 72], sizes = [1, 32], strides = [1, 1]} : vector<1x256xf32> to vector<1x32xf32>
    %10 = vector.extract_strided_slice %6 {offsets = [0, 104], sizes = [1, 32], strides = [1, 1]} : vector<1x256xf32> to vector<1x32xf32>
    %cst = arith.constant dense<0.000000e+00> : vector<1x128xf32>
    %11 = tpu.matmul %7, %0, %cst {dimension_numbers = #tpu.dot_dimension_numbers<[1], [0], [0], [1], [0, 0, 1, 1], [], []>} : vector<1x40xf32>, vector<40x128xf32>, vector<1x128xf32> -> vector<1x128xf32>
    %12 = arith.addf %11, %3 : vector<1x128xf32>
    %13 = arith.negf %12 : vector<1x128xf32>
    %14 = math.exp %13 : vector<1x128xf32>
    %cst_9 = arith.constant 1.000000e+00 : f32
    %15 = vector.broadcast %cst_9 : f32 to vector<1x128xf32>
    %16 = arith.addf %15, %14 : vector<1x128xf32>
    %17 = arith.divf %15, %16 : vector<1x128xf32>
    %18 = math.tanh %12 : vector<1x128xf32>
    %19 = vector.extract_strided_slice %17 {offsets = [0, 0], sizes = [1, 32], strides = [1, 1]} : vector<1x128xf32> to vector<1x32xf32>
    %20 = vector.extract_strided_slice %17 {offsets = [0, 32], sizes = [1, 32], strides = [1, 1]} : vector<1x128xf32> to vector<1x32xf32>
    %21 = vector.extract_strided_slice %18 {offsets = [0, 64], sizes = [1, 32], strides = [1, 1]} : vector<1x128xf32> to vector<1x32xf32>
    %22 = vector.extract_strided_slice %17 {offsets = [0, 96], sizes = [1, 32], strides = [1, 1]} : vector<1x128xf32> to vector<1x32xf32>
    %23 = arith.mulf %20, %9 : vector<1x32xf32>
    %24 = arith.mulf %19, %21 : vector<1x32xf32>
    %25 = arith.addf %23, %24 : vector<1x32xf32>
    %26 = math.tanh %25 : vector<1x32xf32>
    %27 = arith.mulf %22, %26 : vector<1x32xf32>
    %28 = tpu.concatenate %27, %8 in 1 : vector<1x32xf32>, vector<1x32xf32> -> vector<1x64xf32>
    %cst_10 = arith.constant dense<0.000000e+00> : vector<1x128xf32>
    %29 = tpu.matmul %28, %1, %cst_10 {dimension_numbers = #tpu.dot_dimension_numbers<[1], [0], [0], [1], [0, 0, 1, 1], [], []>} : vector<1x64xf32>, vector<64x128xf32>, vector<1x128xf32> -> vector<1x128xf32>
    %30 = arith.addf %29, %4 : vector<1x128xf32>
    %31 = arith.negf %30 : vector<1x128xf32>
    %32 = math.exp %31 : vector<1x128xf32>
    %cst_11 = arith.constant 1.000000e+00 : f32
    %33 = vector.broadcast %cst_11 : f32 to vector<1x128xf32>
    %34 = arith.addf %33, %32 : vector<1x128xf32>
    %35 = arith.divf %33, %34 : vector<1x128xf32>
    %36 = math.tanh %30 : vector<1x128xf32>
    %37 = vector.extract_strided_slice %35 {offsets = [0, 0], sizes = [1, 32], strides = [1, 1]} : vector<1x128xf32> to vector<1x32xf32>
    %38 = vector.extract_strided_slice %35 {offsets = [0, 32], sizes = [1, 32], strides = [1, 1]} : vector<1x128xf32> to vector<1x32xf32>
    %39 = vector.extract_strided_slice %36 {offsets = [0, 64], sizes = [1, 32], strides = [1, 1]} : vector<1x128xf32> to vector<1x32xf32>
    %40 = vector.extract_strided_slice %35 {offsets = [0, 96], sizes = [1, 32], strides = [1, 1]} : vector<1x128xf32> to vector<1x32xf32>
    %41 = arith.mulf %38, %10 : vector<1x32xf32>
    %42 = arith.mulf %37, %39 : vector<1x32xf32>
    %43 = arith.addf %41, %42 : vector<1x32xf32>
    %44 = math.tanh %43 : vector<1x32xf32>
    %45 = arith.mulf %40, %44 : vector<1x32xf32>
    %cst_12 = arith.constant dense<0.000000e+00> : vector<1x128xf32>
    %46 = tpu.matmul %45, %2, %cst_12 {dimension_numbers = #tpu.dot_dimension_numbers<[1], [0], [0], [1], [0, 0, 1, 1], [], []>} : vector<1x32xf32>, vector<32x128xf32>, vector<1x128xf32> -> vector<1x128xf32>
    %47 = arith.addf %46, %5 : vector<1x128xf32>
    %48 = vector.extract_strided_slice %47 {offsets = [0, 0], sizes = [1, 8], strides = [1, 1]} : vector<1x128xf32> to vector<1x8xf32>
    %cst_13 = arith.constant 0.000000e+00 : f32
    %49 = vector.broadcast %cst_13 : f32 to vector<1x120xf32>
    %50 = tpu.concatenate %48, %27, %45, %25, %43, %49 in 1 : vector<1x8xf32>, vector<1x32xf32>, vector<1x32xf32>, vector<1x32xf32>, vector<1x32xf32>, vector<1x120xf32> -> vector<1x256xf32>
    %c0_14 = arith.constant 0 : index
    %c0_15 = arith.constant 0 : index
    %51 = vector.load %arg3[%c0_14, %c0_15] : memref<1x256xf32, #tpu.memory_space<vmem>>, vector<1x256xf32>
    tpu.vector_store %arg3[%c0_14, %c0_15], %50 {strides = array<i32>} : memref<1x256xf32, #tpu.memory_space<vmem>>, vector<1x256xf32>,
    return
  }
}

</mosaic_0001>

<bundles_post_ra>
// kernel: tpu_custom_call.1
= control target key start
LH: loop header
LB: loop body
LE: loop exit
PB: predicated region body
PF: predicated region fallthrough
CT: control target
= control target key end

     0   :  { %8 = vsyncpa [#allocation3], 0  ;;  %s744_s0 = inlined_call_operand.hbm [shape: f32[1,256], index: 0, kind: input, shape index: {}]   ;;  %s745_s1 = inlined_call_operand.hbm [shape: f32[136,128], index: 1, kind: input, shape index: {}]   ;;  %s746_s2 = inlined_call_operand.vmem [shape: f32[3,128], index: 2, kind: input, shape index: {}]   ;;  %s747_s3 = inlined_call_operand.hbm [shape: f32[1,256], index: 3, kind: output, shape index: {}]  }
   0x1   :  { %9 = vsyncpa [#allocation6], 0 }
   0x2   :  { %10 = vsyncpa [#allocation4], 0  ;;  %s617_s12 = smov [#allocation2]   ;;  %s618_s14 = smov [#allocation5]  }
   0x3   :  { %s17_s13 = sshll.u32 %s617_s12, 4  ;;  %s26_s15 = sshll.u32 %s618_s14, 4  ;;  %s18_s13 = int_to_ptr.vmem [resolvable:$true] %s17_s13  ;;  %s653_s15 = int_to_ptr.vmem [resolvable:$true] %s26_s15 }
   0x4   :  { %s545_s18 = scalar_lea.hbm %s744_s0, 32 }
   0x5   :  { %p546_p0 = scmp.ne.s32.totalorder %s744_s0, %s545_s18  ;;  %p549_p1 = scmp.lt.u32.totalorder %s545_s18, %s744_s0 }
   0x7   :  { %p551_p2 = pnand %p549_p1, %p546_p0 }
   0x9   :  { %554 = shalt.err (!%p551_p2)
}
   0xa   :  { %s555_s23 = scalar_lea.vmem %s18_s13, 32  ;;  %p560_p4 = scmp.lt.s32.totalorder %s18_s13, %s18_s13 }
   0xb   :  { %p556_p3 = scmp.ne.s32.totalorder %s18_s13, %s555_s23  ;;  %p561_p5 = scmp.lt.s32.totalorder %s555_s23, %s555_s23 }
   0xd   :  { %p562_p6 = por %p561_p5, %p560_p4 }
   0xf   :  { %p563_p7 = pnand %p562_p6, %p556_p3 }
  0x11   :  { %566 = shalt.err (!%p563_p7)
}
  0x12   :  { %20 = dma.hbm_to_vmem [thread:$0]  %s744_s0, 32, %s18_s13, [#allocation3]  }
  0x13   :  { %s567_s28 = scalar_lea.hbm %s745_s1, 2176 }
  0x14   :  { %p568_p8 = scmp.ne.s32.totalorder %s745_s1, %s567_s28  ;;  %p571_p9 = scmp.lt.u32.totalorder %s567_s28, %s745_s1 }
  0x16   :  { %p573_p10 = pnand %p571_p9, %p568_p8 }
  0x18   :  { %576 = shalt.err (!%p573_p10)
}
  0x19   :  { %s577_s6 = scalar_lea.vmem %s653_s15, 2176  ;;  %p582_p12 = scmp.lt.s32.totalorder %s653_s15, %s653_s15 }
  0x1a   :  { %p578_p11 = scmp.ne.s32.totalorder %s653_s15, %s577_s6  ;;  %p583_p13 = scmp.lt.s32.totalorder %s577_s6, %s577_s6 }
  0x1c   :  { %p584_p0 = por %p583_p13, %p582_p12 }
  0x1e   :  { %p585_p1 = pnand %p584_p0, %p578_p11 }
  0x20   :  { %588 = shalt.err (!%p585_p1)
}
  0x21   :  { %s619_s0 = smov 128   ;;  %s620_s7 = smov 8  }
  0x22   :  { %32 = dma.hbm_to_vmem [thread:$0]  %s745_s1, 2176, %s653_s15, [#allocation6], %s619_s0, %s619_s0, %s620_s7  }
  0x23   :  { %611 = dma.done.wait [#allocation3], 32  }
  0x24   :  { %612 = vsyncadd [#allocation3], 4294967264 }
  0x25   :  { %613 = dma.done.wait [#allocation6], 2176  }
  0x26   :  { %614 = vsyncadd [#allocation6], 4294965120  ;;  %v621_v0 = vmov 0.0|0.0   ;;  %vm622_vm0 = vmmov 0   ;;  %v623_v1 = vmov 0.0   ;;  %v41_v2 = vld [vmem:[#allocation5] sm:$0xff]  ;;  %v143_v14 = vlaneseq }
  0x27   :  { %489 = vmatprep.subr.bf16.mxu0 %v621_v0  ;;  %456 = vmatprep.mubr.msk.f32.mxu0 %vm622_vm0, %v623_v1  ;;  %v42_v3 = vld [vmem:[#allocation5 + $0x8] sm:$0xff]  ;;  %v43_v4 = vld [vmem:[#allocation5 + $0x10] sm:$0xff]  ;;  %v44_v6 = vld [vmem:[#allocation5 + $0x18] sm:$0xff]  ;;  %vm62_vm1 = vcmask 326656   ;;  %s624_s11 = smov 64   ;;  %s625_s12 = smov 88  }
  0x28   :  { %495 = vmatprep.subr.bf16.mxu1 %v621_v0  ;;  %475 = vmatprep.mubr.msk.f32.mxu1 %vm622_vm0, %v623_v1  ;;  %v490_v5 = vpack.c.bf16 %v42_v3, %v41_v2  ;;  %v493_v7 = vpack.c.bf16 %v44_v6, %v43_v4  ;;  %v45_v8 = vld [vmem:[#allocation5 + $0x20] sm:$0xff]  ;;  %v689_v9 = vld [vmem:[#allocation2] sm:$0x3]  ;;  %v58_v10 = vld [vmem:[%s746_s2] sm:$0x1]  ;;  %v699_v15 = vshrl.u32 %v143_v14, 7 }
  0x29   :  { %s626_s13 = smov 32   ;;  %v46_v29 = vld [vmem:[#allocation5 + $0x28] sm:$0xff]  ;;  %v47_v30 = vld [vmem:[#allocation5 + $0x30] sm:$0xff]  ;;  %v48_v31 = vld [vmem:[#allocation5 + $0x38] sm:$0xff]  ;;  %s627_s14 = smov 120   ;;  %vm174_vm2 = vcmask 261120  }
  0x2a   :  { %491 = vmatpush3.bf16.msra.mxu0 %v490_v5  ;;  %v145_v16 = vsub.s32 0, %v699_v15  ;;  %v496_v32 = vpack.c.bf16 %v47_v30, %v46_v29  ;;  %v49_v33 = vld [vmem:[#allocation5 + $0x40] sm:$0xff]  ;;  %v50_v35 = vld [vmem:[#allocation5 + $0x48] sm:$0xff]  ;;  %v51_v36 = vld [vmem:[#allocation5 + $0x50] sm:$0xff]  ;;  %vm176_vm3 = vcmask 523264   ;;  %s628_s15 = smov 56  }
  0x2b   :  { %492 = vmatprep.subr.bf16.mxu0 %v621_v0  ;;  %v499_v34 = vpack.c.bf16 %v49_v33, %v48_v31  ;;  %v502_v37 = vpack.c.bf16 %v51_v36, %v50_v35  ;;  %v52_v38 = vld [vmem:[#allocation5 + $0x58] sm:$0xff]  ;;  %v53_v39 = vld [vmem:[#allocation5 + $0x60] sm:$0xff]  ;;  %v59_v47 = vld [vmem:[%s746_s2 + $0x1] sm:$0x1]  ;;  %v259_v51 = vsub.s32 1, %v699_v15  ;;  %vm265_vm4 = vcmask 457728  }
  0x2c   :  { %v146_v18 = vrot.slane %v689_v9, %v145_v16  ;;  %497 = vmatpush3.bf16.msra.mxu1 %v496_v32  ;;  %v505_v41 = vpack.c.bf16 %v53_v39, %v52_v38  ;;  %v54_v3 = vld [vmem:[#allocation5 + $0x68] sm:$0xff]  ;;  %v55_v4 = vld [vmem:[#allocation5 + $0x70] sm:$0xff]  ;;  %v56_v5 = vld [vmem:[#allocation5 + $0x78] sm:$0xff]  ;;  %s629_s18 = smov 40   ;;  %s630_s19 = smov 72   ;;  %vm374_vm5 = vcmask 64512  }
  0x2d   :  { %498 = vmatprep.subr.bf16.mxu1 %v621_v0  ;;  %v260_v53 = vrot.slane %v689_v9, %v259_v51  ;;  %v508_v6 = vpack.c.bf16 %v55_v4, %v54_v3  ;;  %v631_v16 = vmov 1966171168   ;;  %vm377_vm6 = vcmask 588800   ;;  %s632_s22 = smov [#allocation7]  }
  0x2e   :  { %494 = vmatpush3.bf16.msra.mxu0 %v493_v7  ;;  %v57_v7 = vld [vmem:[#allocation5 + $0x80] sm:$0xff]  ;;  %vm379_vm7 = vcmask 850944   ;;  %vm402_vm8 = vcmp.lt.s32.totalorder %v143_v14, 256 }
  0x2f   :  { %454 = vmatprep.subr.mxu0 %v623_v1 }
  0x30   :  { %500 = vmatpush3.bf16.msra.mxu1 %v499_v34 }
  0x31   :  { %501 = vmatprep.subr.bf16.mxu1 %v621_v0 }
  0x32   :  { %455 = vmatpush3.msra.mxu0 %v45_v8 }
  0x33   :  { %457 = vmatmul.mubr.msk.f32.vlgmr.msra.gmra.mrb[0].mxu0 %vm62_vm1, %v689_v9  ;;  %507 = vmatprep.subr.bf16.mxu0 %v621_v0  ;;  %v511_v9 = vpack.c.bf16 %v57_v7, %v56_v5 }
  0x34   :  { %486 = vmatprep.mubr.msk.f32.mxu0 %vm622_vm0, %v623_v1  ;;  %503 = vmatpush3.bf16.msra.mxu1 %v502_v37 }
  0x35   :  { %504 = vmatprep.subr.bf16.mxu1 %v621_v0  ;;  %509 = vmatpush3.bf16.msra.mxu0 %v508_v6 }
  0x36   :  { %510 = vmatprep.subr.bf16.mxu0 %v621_v0  ;;  %v60_v0 = vld [vmem:[%s746_s2 + $0x2] sm:$0x1]  ;;  %s411_s2 = sshll.u32 %s632_s22, 4  ;;  %s412_s2 = int_to_ptr.vmem [resolvable:$true] %s411_s2 }
  0x37   :  { %s589_s23 = scalar_lea.vmem %s412_s2, 32  ;;  %p594_p3 = scmp.lt.s32.totalorder %s412_s2, %s412_s2 }
  0x38   :  { %506 = vmatpush3.bf16.msra.mxu1 %v505_v41  ;;  %p590_p2 = scmp.ne.s32.totalorder %s412_s2, %s589_s23  ;;  %p595_p4 = scmp.lt.s32.totalorder %s589_s23, %s589_s23 }
  0x39   :  { %512 = vmatpush3.bf16.msra.mxu0 %v511_v9 }
  0x3a   :  { %p596_p5 = por %p595_p4, %p594_p3 }
  0x3c   :  { %p597_p6 = pnand %p596_p5, %p590_p2 }
 0x106   :  { %v132_v11 = vpop.f32.mrb[0].mxu0 }
 0x107   :  { %v133_v12 = vadd.f32 %v132_v11, %v58_v10  ;;  %v458_v13 = vpop.f32.mrb[1].mxu0 }
 0x109   :  { %529 = vtanh.f32 %v133_v12  ;;  %v422_v19 = vmul.f32 -1.442695, %v133_v12 }
 0x10b   :  { %531 = vpow2.f32 %v422_v19 }
 0x113   :  { %v530_v17 = vpop.eup %529 }
 0x114   :  { %152 = vrot.lane.b32.xlu0 %v530_v17, %s624_s11  ;;  %v386_v17 = vunpack.c.l.s4 %v631_v16 }
 0x115   :  { %v532_v20 = vpop.eup %531 }
 0x116   :  { %v139_v21 = vadd.f32 1.0, %v532_v20 }
 0x118   :  { %147 = vrot.lane.b32.xlu0 %v146_v18, %s625_s12  ;;  %533 = vrcp.f32 %v139_v21 }
 0x122   :  { %v534_v22 = vpop.eup %533 }
 0x186   :  { %v153_v23 = vpop.permute.xlu0 %152 }
 0x187   :  { %v155_v24 = vmul.f32 %v534_v22, %v153_v23 }
 0x189   :  { %157 = vrot.lane.b32.xlu1 %v155_v24, %s626_s13 }
 0x18a   :  { %v148_v25 = vpop.permute.xlu0 %147 }
 0x18b   :  { %v150_v26 = vmul.f32 %v534_v22, %v148_v25 }
 0x1fb   :  { %v158_v27 = vpop.permute.xlu1 %157 }
 0x1fc   :  { %v705_v28 = vadd.f32 %v158_v27, %v150_v26 }
 0x1fe   :  { %535 = vtanh.f32 %v705_v28 }
 0x208   :  { %v536_v40 = vpop.eup %535 }
 0x209   :  { %163 = vrot.lane.b32.xlu1 %v536_v40, %s624_s11 }
 0x20d   :  { %171 = vrot.lane.b32.xlu1 %v146_v18, %s627_s14 }
 0x211   :  { %261 = vrot.lane.b32.xlu1 %v146_v18, %s628_s15 }
 0x27b   :  { %v164_v42 = vpop.permute.xlu1 %163 }
 0x27c   :  { %v166_v43 = vmul.f32 %v534_v22, %v164_v42  ;;  %v387_v22 = vunpack.c.0.s8 %v386_v17 }
 0x27e   :  { %168 = vrot.lane.b32.xlu0 %v166_v43, %s626_s13 }
 0x27f   :  { %v172_v44 = vpop.permute.xlu1 %171 }
 0x283   :  { %v262_v61 = vpop.permute.xlu1 %261 }
 0x2f0   :  { %v169_v45 = vpop.permute.xlu0 %168 }
 0x2f1   :  { %v175_v46 = vsel %vm174_vm2, %v169_v45, %v172_v44 }
 0x2f2   :  { %476 = vmatmul.mubr.msk.f32.vlgmr.msra.gmra.mrb[0].mxu1 %vm176_vm3, %v175_v46 }
 0x3c5   :  { %v246_v48 = vpop.f32.mrb[0].mxu1 }
 0x3c6   :  { %v247_v49 = vadd.f32 %v246_v48, %v59_v47  ;;  %v477_v50 = vpop.f32.mrb[1].mxu1 }
 0x3c8   :  { %537 = vtanh.f32 %v247_v49  ;;  %v424_v54 = vmul.f32 -1.442695, %v247_v49 }
 0x3ca   :  { %539 = vpow2.f32 %v424_v54 }
 0x3d2   :  { %v538_v52 = vpop.eup %537 }
 0x3d3   :  { %270 = vrot.lane.b32.xlu0 %v538_v52, %s624_s11 }
 0x3d4   :  { %v540_v55 = vpop.eup %539 }
 0x3d5   :  { %v253_v56 = vadd.f32 1.0, %v540_v55 }
 0x3d7   :  { %263 = vrot.lane.b32.xlu0 %v260_v53, %s628_s15  ;;  %541 = vrcp.f32 %v253_v56 }
 0x3e1   :  { %v542_v57 = vpop.eup %541 }
 0x445   :  { %v271_v58 = vpop.permute.xlu0 %270 }
 0x446   :  { %v273_v59 = vmul.f32 %v542_v57, %v271_v58 }
 0x448   :  { %275 = vrot.lane.b32.xlu1 %v273_v59, %s626_s13 }
 0x449   :  { %v264_v60 = vpop.permute.xlu0 %263 }
 0x44a   :  { %v266_v62 = vsel %vm265_vm4, %v262_v61, %v264_v60 }
 0x44b   :  { %v268_v63 = vmul.f32 %v542_v57, %v266_v62 }
 0x4ba   :  { %v276_v1 = vpop.permute.xlu1 %275 }
 0x4bb   :  { %v278_v2 = vadd.f32 %v276_v1, %v268_v63 }
 0x4bd   :  { %543 = vtanh.f32 %v278_v2 }
 0x4c7   :  { %v544_v8 = vpop.eup %543 }
 0x4c8   :  { %281 = vrot.lane.b32.xlu0 %v544_v8, %s624_s11 }
 0x4cc   :  { %360 = vrot.lane.b32.xlu0 %v166_v43, %s629_s18 }
 0x4d0   :  { %367 = vrot.lane.b32.xlu0 %v705_v28, %s629_s18  ;;  %v390_v28 = vsub.s32 %v387_v22, %v699_v15 }
 0x53a   :  { %v282_v10 = vpop.permute.xlu0 %281 }
 0x53b   :  { %v284_v11 = vmul.f32 %v542_v57, %v282_v10 }
 0x53d   :  { %286 = vrot.lane.b32.xlu1 %v284_v11, %s626_s13 }
 0x53e   :  { %v361_v18 = vpop.permute.xlu0 %360 }
 0x541   :  { %363 = vrot.lane.b32.xlu1 %v284_v11, %s630_s19 }
 0x542   :  { %v368_v25 = vpop.permute.xlu0 %367 }
 0x545   :  { %371 = vrot.lane.b32.xlu1 %v278_v2, %s630_s19 }
 0x5af   :  { %v287_v12 = vpop.permute.xlu1 %286 }
 0x5b0   :  { %487 = vmatmul.mubr.msk.f32.vlgmr.msra.gmra.mrb[2].mxu0 %vm174_vm2, %v287_v12 }
 0x5b3   :  { %v364_v13 = vpop.permute.xlu1 %363 }
 0x5b7   :  { %v372_v23 = vpop.permute.xlu1 %371 }
 0x5b8   :  { %v381_v29 = vsel %vm374_vm5, %v372_v23, 0.0 }
 0x683   :  { %v356_v19 = vpop.f32.mrb[2].mxu0 }
 0x684   :  { %v357_v20 = vadd.f32 %v356_v19, %v60_v0  ;;  %v488_v21 = vpop.f32.mrb[3].mxu0 }
 0x686   :  { %v375_v24 = vsel %vm374_vm5, %v357_v20, %v361_v18 }
 0x687   :  { %v376_v26 = vsel %vm62_vm1, %v375_v24, %v364_v13 }
 0x688   :  { %v378_v27 = vsel %vm377_vm6, %v376_v26, %v368_v25 }
 0x689   :  { %v380_v30 = vsel %vm379_vm7, %v378_v27, %v372_v23 }
 0x68a   :  { %v384_v31 = vcombine.low %v380_v30, %v381_v29 }
 0x68c   :  { %v391_v32 = vrot.slane %v384_v31, %v390_v28 }
 0x68e   :  { %v398_v33 = vrot.slane %v391_v32, %v390_v28 }
 0x690   :  { %404 = vst.msk [vmem:[#allocation7] sm:$0x3] %vm402_vm8, %v398_v33 }
 0x691   :  { %600 = shalt.err (!%p597_p6)
}
 0x692   :  { %s601_s26 = scalar_lea.hbm %s747_s3, 32 }
 0x693   :  { %p602_p7 = scmp.ne.s32.totalorder %s747_s3, %s601_s26  ;;  %p605_p8 = scmp.lt.u32.totalorder %s601_s26, %s747_s3 }
 0x695   :  { %p607_p9 = pnand %p605_p8, %p602_p7 }
 0x697   :  { %610 = shalt.err (!%p607_p9)
}
 0x698   :  { %414 = dma.vmem_to_hbm [thread:$0]  %s412_s2, 32, %s747_s3, [#allocation4]  }
 0x699   :  { %615 = dma.done.wait [#allocation4], 32  }
 0x69a   :  { %616 = vsyncadd [#allocation4], 4294967264 }
 0x69b   :  { %418 = vsyncpa [#allocation3], 1 }
 0x69c   :  { %419 = vsyncpa [#allocation6], 1 }
 0x69d   :  { %420 = vsyncpa [#allocation4], 1 }

</bundles_post_ra>
